<compile_context>
chip_gen: v7x
topology: tpu7x:2x2x1
jax: 0.10.0
libtpu: 0.0.40
codegen_flags: <defaults>
</compile_context>

<pallas_src>
import jax
import jax.numpy as jnp
from jax.experimental import pallas as pl
from jax.experimental.pallas import tpu as pltpu

NEG_SLOPE = 0.01  # PyTorch F.leaky_relu default


def _leaky_relu(x):
    # For 0 < slope < 1: max(x, slope*x) == leaky_relu(x). 2 VPU ops.
    return jnp.maximum(x, NEG_SLOPE * x)


def mlp_kernel(x_ref, w1_ref, b1_ref, w2_ref, b2_ref, w3_ref, b3_ref, o_ref):
    # x_ref:  [tile_b, D]   f32    (batch tile; cast to bf16 in-kernel)
    # w1_ref: [D,  H1]      bf16   (resident across grid steps)
    # w2_ref: [H1, H2]      bf16
    # b1/b2:  [1, H]        f32
    # w3_ref: [1, H2]       f32    (final layer on VPU/XLU, not MXU)
    # b3_ref: [1, 1]        f32
    # o_ref:  [1, tile_b]   f32    (lane-dense: batch on the lane axis)
    x_bf16 = x_ref[...].astype(jnp.bfloat16)  # VPU cast, hidden under MXU push
    h1 = jnp.dot(x_bf16, w1_ref[...], preferred_element_type=jnp.float32)
    h1 = _leaky_relu(h1 + b1_ref[...])                        # [tile_b, H1] f32

    h2 = jnp.dot(h1.astype(jnp.bfloat16), w2_ref[...],
                 preferred_element_type=jnp.float32)
    h2 = _leaky_relu(h2 + b2_ref[...])                        # [tile_b, H2] f32

    # N=1 output layer: VPU multiply + lane (XLU) reduction instead of an MXU
    # matmul that would fill 1/256 of the systolic array columns.
    y = jnp.sum(h2 * w3_ref[...], axis=-1)                    # [tile_b] f32
    o_ref[...] = (y[None, :] + b3_ref[...]).astype(o_ref.dtype)


def _num_tensorcores():
    """Best-effort TensorCore-per-chip count (2 on v7x, 1 on v5e/v6e)."""
    try:
        info = pltpu.get_tpu_info()
        for attr in ("num_cores", "tensorcores_per_chip", "num_tensorcores"):
            v = getattr(info, attr, None)
            if isinstance(v, int) and v > 0:
                return v
    except Exception:
        pass
    try:
        v = getattr(jax.devices()[0], "num_cores", None)
        if isinstance(v, int) and v > 0:
            return v
    except Exception:
        pass
    return 1


_MAX_TILE_B = 2048  # big enough to amortize ~0.35us/step, tiny vs VMEM budget


def _choose_tile_b(B, num_cores):
    # Dual-TC (v7x): prefer exactly num_cores large tiles so both cores work.
    if num_cores >= 2 and B % 2 == 0:
        half = B // 2
        if half <= _MAX_TILE_B and half % 8 == 0:
            return half
    # Single-TC (v5e/v6e) or small B: one maximal full-extent tile.
    if B <= _MAX_TILE_B:
        return B
    # B > cap: largest multiple-of-8 divisor <= cap, preferring an even split
    # across cores.
    best = None
    start = _MAX_TILE_B - (_MAX_TILE_B % 8)
    for cand in range(start, 7, -8):
        if B % cand == 0:
            steps = B // cand
            if num_cores <= 1 or steps % num_cores == 0:
                return cand
            if best is None:
                best = cand
    return best if best is not None else B


def age_predictor_mlp(x, params, *, tile_b=None):
    """Fused fc1 -> leaky_relu -> fc2 -> leaky_relu -> fc3.

    x: [B, input_size] float32.
    params: w1 [D,H1], b1 [1,H1], w2 [H1,H2], b2 [1,H2], w3 [H2,1], b3 [1,1].
    Returns [B, 1] float32.
    """
    B, D = x.shape
    H1 = params["w1"].shape[1]
    H2 = params["w2"].shape[1]

    if tile_b is None:
        tile_b = _choose_tile_b(B, _num_tensorcores())
    assert B % tile_b == 0, "batch must be divisible by tile_b"
    assert tile_b == B or tile_b % 8 == 0, \
        "tile_b must be a multiple of 8 (f32 sublane) unless it is the full batch"
    num_tiles = B // tile_b

    # Weights feeding the MXU in bf16 (halves their DMA bytes); x stays f32 at
    # the kernel boundary and is cast in-kernel. Biases / final weight are f32.
    w1 = params["w1"].astype(jnp.bfloat16)
    w2 = params["w2"].astype(jnp.bfloat16)
    w3_row = params["w3"].reshape(1, H2).astype(jnp.float32)

    in_specs = [
        pl.BlockSpec((tile_b, D), lambda i: (i, 0)),   # x batch tile (f32)
        pl.BlockSpec((D, H1), lambda i: (0, 0)),       # w1 (VMEM-resident)
        pl.BlockSpec((1, H1), lambda i: (0, 0)),       # b1
        pl.BlockSpec((H1, H2), lambda i: (0, 0)),      # w2
        pl.BlockSpec((1, H2), lambda i: (0, 0)),       # b2
        pl.BlockSpec((1, H2), lambda i: (0, 0)),       # w3 as a row
        pl.BlockSpec((1, 1), lambda i: (0, 0)),        # b3
    ]
    # Lane-dense output: one full-lane (1, tile_b) row per grid step instead of
    # a (tile_b, 1) column of masked vst.msk partial stores / 4B-per-row DMAs.
    out_spec = pl.BlockSpec((1, tile_b), lambda i: (i, 0))

    out = pl.pallas_call(
        mlp_kernel,
        out_shape=jax.ShapeDtypeStruct((num_tiles, tile_b), jnp.float32),
        grid_spec=pltpu.PrefetchScalarGridSpec(
            num_scalar_prefetch=0,
            grid=(num_tiles,),
            in_specs=in_specs,
            out_specs=out_spec,
        ),
        compiler_params=pltpu.CompilerParams(
            dimension_semantics=("parallel",),
        ),
    )(x, w1, params["b1"], w2, params["b2"], w3_row, params["b3"])

    return out.reshape(B, 1)


def init_params(key, input_size, hidden1=256, hidden2=128):
    """Deterministic init mimicking nn.Linear's U(-1/sqrt(fan_in), 1/sqrt(fan_in))."""
    ks = jax.random.split(key, 6)

    def linear(kw, kb, fan_in, fan_out):
        bound = 1.0 / jnp.sqrt(fan_in)
        w = jax.random.uniform(kw, (fan_in, fan_out), jnp.float32, -bound, bound)
        b = jax.random.uniform(kb, (1, fan_out), jnp.float32, -bound, bound)
        return w, b

    w1, b1 = linear(ks[0], ks[1], input_size, hidden1)
    w2, b2 = linear(ks[2], ks[3], hidden1, hidden2)
    w3, b3 = linear(ks[4], ks[5], hidden2, 1)
    return {"w1": w1, "b1": b1, "w2": w2, "b2": b2, "w3": w3, "b3": b3}


def reference_forward_f32(x, p):
    def lrelu(v):
        return jnp.where(v > 0, v, NEG_SLOPE * v)
    h1 = lrelu(x @ p["w1"] + p["b1"])
    h2 = lrelu(h1 @ p["w2"] + p["b2"])
    return h2 @ p["w3"] + p["b3"]


def reference_forward_matched(x, p):
    # Same numerics as the kernel: bf16 MXU operands, f32 accumulation,
    # f32 elementwise, f32 final layer.
    h1 = jnp.dot(x.astype(jnp.bfloat16), p["w1"].astype(jnp.bfloat16),
                 preferred_element_type=jnp.float32)
    h1 = _leaky_relu(h1 + p["b1"])
    h2 = jnp.dot(h1.astype(jnp.bfloat16), p["w2"].astype(jnp.bfloat16),
                 preferred_element_type=jnp.float32)
    h2 = _leaky_relu(h2 + p["b2"])
    return h2 @ p["w3"] + p["b3"]


if __name__ == "__main__":
    key = jax.random.PRNGKey(0)
    k_x, k_p, k_x2 = jax.random.split(key, 3)

    input_size = 32
    hidden1, hidden2 = 256, 128
    params = init_params(k_p, input_size, hidden1, hidden2)

    # Small case: single full-extent batch tile (grid = (1,)).
    batch = 8
    x = jax.random.normal(k_x, (batch, input_size), dtype=jnp.float32)
    out = jax.block_until_ready(age_predictor_mlp(x, params))
    assert out.shape == (batch, 1)
    ref_m = reference_forward_matched(x, params)
    ref_f = reference_forward_f32(x, params)
    assert jnp.allclose(out, ref_m, atol=2e-3, rtol=2e-3), "mismatch vs matched reference"
    assert jnp.allclose(out, ref_f, atol=1e-1, rtol=1e-1), "mismatch vs f32 reference"

    # Larger case: exercises the generation-aware tile policy (1 big tile on
    # 1-TC chips, 2 tiles on v7x) and the lane-dense tiled output path.
    batch2 = 512
    x2 = jax.random.normal(k_x2, (batch2, input_size), dtype=jnp.float32)
    out2 = jax.block_until_ready(age_predictor_mlp(x2, params))
    assert out2.shape == (batch2, 1)
    ref2 = reference_forward_matched(x2, params)
    assert jnp.allclose(out2, ref2, atol=2e-3, rtol=2e-3), "mismatch (tiled path)"

    # Also exercise an explicit multi-step tiling to cover the i>0 index_map path.
    out3 = jax.block_until_ready(age_predictor_mlp(x2, params, tile_b=128))
    assert jnp.allclose(out3, ref2, atol=2e-3, rtol=2e-3), "mismatch (forced 4-step tiling)"

    print("KERNEL_OK")
</pallas_src>

<mosaic_0001>
module attributes {stable_mosaic.version = 11 : i64} {
  func.func @mlp_kernel(%arg0: i32, %arg1: memref<8x32xf32, #tpu.memory_space<vmem>>, %arg2: memref<32x256xbf16, #tpu.memory_space<vmem>>, %arg3: memref<1x256xf32, #tpu.memory_space<vmem>>, %arg4: memref<256x128xbf16, #tpu.memory_space<vmem>>, %arg5: memref<1x128xf32, #tpu.memory_space<vmem>>, %arg6: memref<1x128xf32, #tpu.memory_space<vmem>>, %arg7: memref<1x1xf32, #tpu.memory_space<vmem>>, %arg8: memref<1x8xf32, #tpu.memory_space<vmem>>) attributes {dimension_semantics = [#tpu.dimension_semantics<parallel>], iteration_bounds = array<i64: 1>, scalar_prefetch = 0 : i64, scratch_operands = 0 : i64, tpu.core_type = #tpu.core_type<tc>, window_params = [{transform_indices = @transform_0, window_bounds = array<i64: 8, 32>}, {pipeline_mode = #tpu.pipeline_mode<synchronous>, transform_indices = @transform_1, window_bounds = array<i64: 32, 256>}, {pipeline_mode = #tpu.pipeline_mode<synchronous>, transform_indices = @transform_2, window_bounds = array<i64: 1, 256>}, {pipeline_mode = #tpu.pipeline_mode<synchronous>, transform_indices = @transform_3, window_bounds = array<i64: 256, 128>}, {pipeline_mode = #tpu.pipeline_mode<synchronous>, transform_indices = @transform_4, window_bounds = array<i64: 1, 128>}, {pipeline_mode = #tpu.pipeline_mode<synchronous>, transform_indices = @transform_5, window_bounds = array<i64: 1, 128>}, {pipeline_mode = #tpu.pipeline_mode<synchronous>, transform_indices = @transform_6, window_bounds = array<i64: 1, 1>}, {transform_indices = @transform_7, window_bounds = array<i64: 1, 8>}]} {
    %c0 = arith.constant 0 : index
    %c0_0 = arith.constant 0 : index
    %0 = vector.load %arg1[%c0, %c0_0] : memref<8x32xf32, #tpu.memory_space<vmem>>, vector<8x32xf32>
    %1 = arith.truncf %0 : vector<8x32xf32> to vector<8x32xbf16>
    %c0_1 = arith.constant 0 : index
    %c0_2 = arith.constant 0 : index
    %2 = vector.load %arg2[%c0_1, %c0_2] : memref<32x256xbf16, #tpu.memory_space<vmem>>, vector<32x256xbf16>
    %cst = arith.constant dense<0.000000e+00> : vector<8x256xf32>
    %3 = tpu.matmul %1, %2, %cst {dimension_numbers = #tpu.dot_dimension_numbers<[1], [0], [0], [1], [0, 0, 1, 1], [], []>} : vector<8x32xbf16>, vector<32x256xbf16>, vector<8x256xf32> -> vector<8x256xf32>
    %c0_3 = arith.constant 0 : index
    %c0_4 = arith.constant 0 : index
    %4 = vector.load %arg3[%c0_3, %c0_4] : memref<1x256xf32, #tpu.memory_space<vmem>>, vector<1x256xf32>
    %5 = vector.broadcast %4 : vector<1x256xf32> to vector<8x256xf32>
    %6 = arith.addf %3, %5 : vector<8x256xf32>
    %cst_5 = arith.constant 0.00999999977 : f32
    %7 = vector.broadcast %cst_5 : f32 to vector<8x256xf32>
    %8 = arith.mulf %7, %6 : vector<8x256xf32>
    %9 = arith.maximumf %6, %8 : vector<8x256xf32>
    %10 = arith.truncf %9 : vector<8x256xf32> to vector<8x256xbf16>
    %c0_6 = arith.constant 0 : index
    %c0_7 = arith.constant 0 : index
    %11 = vector.load %arg4[%c0_6, %c0_7] : memref<256x128xbf16, #tpu.memory_space<vmem>>, vector<256x128xbf16>
    %cst_8 = arith.constant dense<0.000000e+00> : vector<8x128xf32>
    %12 = tpu.matmul %10, %11, %cst_8 {dimension_numbers = #tpu.dot_dimension_numbers<[1], [0], [0], [1], [0, 0, 1, 1], [], []>} : vector<8x256xbf16>, vector<256x128xbf16>, vector<8x128xf32> -> vector<8x128xf32>
    %c0_9 = arith.constant 0 : index
    %c0_10 = arith.constant 0 : index
    %13 = vector.load %arg5[%c0_9, %c0_10] : memref<1x128xf32, #tpu.memory_space<vmem>>, vector<1x128xf32>
    %14 = vector.broadcast %13 : vector<1x128xf32> to vector<8x128xf32>
    %15 = arith.addf %12, %14 : vector<8x128xf32>
    %cst_11 = arith.constant 0.00999999977 : f32
    %16 = vector.broadcast %cst_11 : f32 to vector<8x128xf32>
    %17 = arith.mulf %16, %15 : vector<8x128xf32>
    %18 = arith.maximumf %15, %17 : vector<8x128xf32>
    %c0_12 = arith.constant 0 : index
    %c0_13 = arith.constant 0 : index
    %19 = vector.load %arg6[%c0_12, %c0_13] : memref<1x128xf32, #tpu.memory_space<vmem>>, vector<1x128xf32>
    %20 = vector.broadcast %19 : vector<1x128xf32> to vector<8x128xf32>
    %21 = arith.mulf %18, %20 : vector<8x128xf32>
    %cst_14 = arith.constant dense<0.000000e+00> : vector<8xf32>
    %22 = vector.multi_reduction <add>, %21, %cst_14 [1] : vector<8x128xf32> to vector<8xf32>
    %23 = vector.shape_cast %22 : vector<8xf32> to vector<1x8xf32>
    %c0_15 = arith.constant 0 : index
    %c0_16 = arith.constant 0 : index
    %24 = vector.load %arg7[%c0_15, %c0_16] : memref<1x1xf32, #tpu.memory_space<vmem>>, vector<1x1xf32>
    %25 = vector.broadcast %24 : vector<1x1xf32> to vector<1x8xf32>
    %26 = arith.addf %23, %25 : vector<1x8xf32>
    %c0_17 = arith.constant 0 : index
    %c0_18 = arith.constant 0 : index
    %27 = vector.load %arg8[%c0_17, %c0_18] : memref<1x8xf32, #tpu.memory_space<vmem>>, vector<1x8xf32>
    tpu.vector_store %arg8[%c0_17, %c0_18], %26 {strides = array<i32>} : memref<1x8xf32, #tpu.memory_space<vmem>>, vector<1x8xf32>,
    return
  }
  func.func @transform_0(%arg0: i32) -> (i32, i32) {
    %c0_i32 = arith.constant 0 : i32
    %c0_i32_0 = arith.constant 0 : i32
    return %arg0, %c0_i32 : i32, i32
  }
  func.func @transform_1(%arg0: i32) -> (i32, i32) {
    %c0_i32 = arith.constant 0 : i32
    %c0_i32_0 = arith.constant 0 : i32
    %c0_i32_1 = arith.constant 0 : i32
    return %c0_i32, %c0_i32_0 : i32, i32
  }
  func.func @transform_2(%arg0: i32) -> (i32, i32) {
    %c0_i32 = arith.constant 0 : i32
    %c0_i32_0 = arith.constant 0 : i32
    %c0_i32_1 = arith.constant 0 : i32
    return %c0_i32, %c0_i32_0 : i32, i32
  }
  func.func @transform_3(%arg0: i32) -> (i32, i32) {
    %c0_i32 = arith.constant 0 : i32
    %c0_i32_0 = arith.constant 0 : i32
    %c0_i32_1 = arith.constant 0 : i32
    return %c0_i32, %c0_i32_0 : i32, i32
  }
  func.func @transform_4(%arg0: i32) -> (i32, i32) {
    %c0_i32 = arith.constant 0 : i32
    %c0_i32_0 = arith.constant 0 : i32
    %c0_i32_1 = arith.constant 0 : i32
    return %c0_i32, %c0_i32_0 : i32, i32
  }
  func.func @transform_5(%arg0: i32) -> (i32, i32) {
    %c0_i32 = arith.constant 0 : i32
    %c0_i32_0 = arith.constant 0 : i32
    %c0_i32_1 = arith.constant 0 : i32
    return %c0_i32, %c0_i32_0 : i32, i32
  }
  func.func @transform_6(%arg0: i32) -> (i32, i32) {
    %c0_i32 = arith.constant 0 : i32
    %c0_i32_0 = arith.constant 0 : i32
    %c0_i32_1 = arith.constant 0 : i32
    return %c0_i32, %c0_i32_0 : i32, i32
  }
  func.func @transform_7(%arg0: i32) -> (i32, i32) {
    %c0_i32 = arith.constant 0 : i32
    %c0_i32_0 = arith.constant 0 : i32
    return %arg0, %c0_i32 : i32, i32
  }
}

</mosaic_0001>

<bundles_post_ra>
// kernel: tpu_custom_call.1
= control target key start
LH: loop header
LB: loop body
LE: loop exit
PB: predicated region body
PF: predicated region fallthrough
CT: control target
= control target key end

     0   :  { %s662_s0 = inlined_call_operand.hbm [shape: f32[8,32], index: 0, kind: input, shape index: {}]   ;;  %s663_s1 = inlined_call_operand.hbm [shape: bf16[32,256], index: 1, kind: input, shape index: {}]   ;;  %s664_s2 = inlined_call_operand.vmem [shape: f32[1,256], index: 2, kind: input, shape index: {}]   ;;  %s665_s3 = inlined_call_operand.hbm [shape: bf16[256,128], index: 3, kind: input, shape index: {}]   ;;  %s666_s4 = inlined_call_operand.vmem [shape: f32[1,128], index: 4, kind: input, shape index: {}]   ;;  %s667_s5 = inlined_call_operand.vmem [shape: f32[1,128], index: 5, kind: input, shape index: {}]   ;;  %s668_s6 = inlined_call_operand.<no memory space> [shape: f32[1,1], index: 6, kind: input, shape index: {}]   ;;  %s669_s7 = inlined_call_operand.hbm [shape: f32[1,8], index: 7, kind: output, shape index: {}]  }
   0x1   :  { %v12_v0 = vstv %s668_s6 }
   0x2   :  { %13 = vst [vmem:[#allocation2] sm:$0x1] %v12_v0 }
   0x3   :  { %14 = vsyncpa [#allocation4], 0 }
   0x4   :  { %15 = vsyncpa [#allocation7], 0 }
   0x5   :  { %16 = vsyncpa [#allocation5], 0  ;;  %s553_s26 = smov [#allocation6]   ;;  %s459_s30 = scalar_lea.hbm %s663_s1, 512 }
   0x6   :  { %s32_s27 = sshll.u32 %s553_s26, 4  ;;  %p460_p0 = scmp.ne.s32.totalorder %s663_s1, %s459_s30  ;;  %s33_s27 = int_to_ptr.vmem [resolvable:$true] %s32_s27 }
   0x7   :  { %p463_p1 = scmp.lt.u32.totalorder %s459_s30, %s663_s1 }
   0x9   :  { %p465_p2 = pnand %p463_p1, %p460_p0 }
   0xb   :  { %468 = shalt.err (!%p465_p2)
}
   0xc   :  { %s469_s6 = scalar_lea.vmem %s33_s27, 512  ;;  %p474_p4 = scmp.lt.s32.totalorder %s33_s27, %s33_s27 }
   0xd   :  { %p470_p3 = scmp.ne.s32.totalorder %s33_s27, %s469_s6  ;;  %p475_p5 = scmp.lt.s32.totalorder %s469_s6, %s469_s6 }
   0xf   :  { %p476_p6 = por %p475_p5, %p474_p4 }
  0x11   :  { %p477_p7 = pnand %p476_p6, %p470_p3 }
  0x13   :  { %480 = shalt.err (!%p477_p7)
}
  0x14   :  { %s554_s12 = smov 128   ;;  %s555_s13 = smov 8  }
  0x15   :  { %38 = dma.hbm_to_vmem [thread:$0]  %s663_s1, 512, %s33_s27, [#allocation7], %s554_s12, %s554_s12, %s555_s13  }
  0x16   :  { %s556_s16 = smov [#allocation3]   ;;  %s557_s18 = smov [#allocation8]  }
  0x17   :  { %s23_s17 = sshll.u32 %s556_s16, 4  ;;  %s46_s19 = sshll.u32 %s557_s18, 4  ;;  %s24_s17 = int_to_ptr.vmem [resolvable:$true] %s23_s17  ;;  %s47_s19 = int_to_ptr.vmem [resolvable:$true] %s46_s19 }
  0x18   :  { %s481_s22 = scalar_lea.hbm %s662_s0, 128 }
  0x19   :  { %p482_p8 = scmp.ne.s32.totalorder %s662_s0, %s481_s22  ;;  %p485_p9 = scmp.lt.u32.totalorder %s481_s22, %s662_s0 }
  0x1b   :  { %p487_p10 = pnand %p485_p9, %p482_p8 }
  0x1d   :  { %490 = shalt.err (!%p487_p10)
}
  0x1e   :  { %s491_s1 = scalar_lea.vmem %s24_s17, 128  ;;  %p496_p12 = scmp.lt.s32.totalorder %s24_s17, %s24_s17 }
  0x1f   :  { %p492_p11 = scmp.ne.s32.totalorder %s24_s17, %s491_s1  ;;  %p497_p13 = scmp.lt.s32.totalorder %s491_s1, %s491_s1 }
  0x21   :  { %p498_p0 = por %p497_p13, %p496_p12 }
  0x23   :  { %p499_p1 = pnand %p498_p0, %p492_p11 }
  0x25   :  { %502 = shalt.err (!%p499_p1)
}
  0x26   :  { %26 = dma.hbm_to_vmem [thread:$0]  %s662_s0, 128, %s24_s17, [#allocation4]  }
  0x27   :  { %s503_s8 = scalar_lea.hbm %s665_s3, 2048 }
  0x28   :  { %p504_p2 = scmp.ne.s32.totalorder %s665_s3, %s503_s8  ;;  %p507_p3 = scmp.lt.u32.totalorder %s503_s8, %s665_s3 }
  0x2a   :  { %p509_p4 = pnand %p507_p3, %p504_p2 }
  0x2c   :  { %512 = shalt.err (!%p509_p4)
}
  0x2d   :  { %s513_s12 = scalar_lea.vmem %s47_s19, 2048  ;;  %p518_p6 = scmp.lt.s32.totalorder %s47_s19, %s47_s19 }
  0x2e   :  { %p514_p5 = scmp.ne.s32.totalorder %s47_s19, %s513_s12  ;;  %p519_p7 = scmp.lt.s32.totalorder %s513_s12, %s513_s12 }
  0x30   :  { %p520_p8 = por %p519_p7, %p518_p6 }
  0x32   :  { %p521_p9 = pnand %p520_p8, %p514_p5 }
  0x34   :  { %524 = shalt.err (!%p521_p9)
}
  0x35   :  { %s558_s0 = smov 64   ;;  %s559_s13 = smov 4  }
  0x36   :  { %52 = dma.hbm_to_vmem [thread:$0]  %s665_s3, 2048, %s47_s19, [#allocation7], %s558_s0, %s558_s0, %s559_s13  }
  0x37   :  { %547 = dma.done.wait [#allocation4], 128  }
  0x38   :  { %548 = vsyncadd [#allocation4], 4294967168 }
  0x39   :  { %549 = dma.done.wait [#allocation7], 2560  }
  0x3a   :  { %550 = vsyncadd [#allocation7], 4294964736  ;;  %v560_v1 = vmov 0   ;;  %v437_v2 = vld [vmem:[#allocation6 + $0x4] ss:$8 sps:$4 sm:$0xff]   ;;  %v69_v6 = vld [vmem:[#allocation3] sm:$0xff]  ;;  %v77_v24 = vlaneseq }
  0x3b   :  { %143 = vmatprep.mubr.bf16.mxu0 %v560_v1  ;;  %436 = vset.pattern.permute.xlu0 %v560_v1  ;;  %v439_v3 = vld [vmem:[#allocation6] ss:$8 sps:$4 sm:$0xff]   ;;  %v440_v4 = vld [vmem:[#allocation6 + $0x14] ss:$8 sps:$4 sm:$0xff]   ;;  %v442_v5 = vld [vmem:[#allocation6 + $0x10] ss:$8 sps:$4 sm:$0xff]   ;;  %v70_v10 = vpack.c.bf16 %v69_v6, %v69_v6 }
  0x3c   :  { %111 = vmatprep.subr.bf16.mxu0 %v437_v2  ;;  %v443_v7 = vld [vmem:[#allocation8 + $0x40] sm:$0xff]   ;;  %v445_v9 = vld [vmem:[#allocation8 + $0x48] sm:$0xff]   ;;  %vm107_vm0 = vcmask 261120   ;;  %v447_v12 = vld [vmem:[#allocation8 + $0x50] sm:$0xff]   ;;  %v78_v25 = vshrl.u32 %v77_v24, 7  ;;  %v358_v56 = vand.u32 127, %v77_v24 }
  0x3d   :  { %112 = vmatpush1.bf16.msra.mxu0 %v439_v3  ;;  %v444_v8 = vld [vmem:[#allocation8] sm:$0xff]   ;;  %405 = vmatprep.subr.bf16.mxu1 %v443_v7  ;;  %v446_v11 = vld [vmem:[#allocation8 + $0x8] sm:$0xff]   ;;  %v448_v13 = vld [vmem:[#allocation8 + $0x10] sm:$0xff]   ;;  %vm364_vm1 = vcmask 57344  }
  0x3e   :  { %113 = vmatprep.subr.bf16.mxu0 %v440_v4  ;;  %406 = vmatpush3.bf16.msra.mxu1 %v444_v8  ;;  %v449_v14 = vld [vmem:[#allocation8 + $0x58] sm:$0xff]   ;;  %v451_v16 = vld [vmem:[#allocation8 + $0x60] sm:$0xff]   ;;  %v453_v18 = vld [vmem:[#allocation8 + $0x68] sm:$0xff]   ;;  %v79_v26 = vsub.s32 0, %v78_v25  ;;  %v83_v28 = vsub.s32 1, %v78_v25  ;;  %v361_v58 = vsub.s32 %v358_v56, %v78_v25 }
  0x3f   :  { %407 = vmatprep.subr.bf16.mxu1 %v445_v9  ;;  %v450_v15 = vld [vmem:[#allocation8 + $0x18] sm:$0xff]   ;;  %v452_v17 = vld [vmem:[#allocation8 + $0x20] sm:$0xff]   ;;  %v454_v19 = vld [vmem:[#allocation8 + $0x28] sm:$0xff]  }
  0x40   :  { %v455_v20 = vld [vmem:[#allocation8 + $0x70] sm:$0xff]   ;;  %v457_v22 = vld [vmem:[#allocation8 + $0x78] sm:$0xff]  }
  0x41   :  { %114 = vmatpush1.bf16.msra.mxu0 %v442_v5  ;;  %v456_v21 = vld [vmem:[#allocation8 + $0x30] sm:$0xff]   ;;  %v458_v23 = vld [vmem:[#allocation8 + $0x38] sm:$0xff]  }
  0x42   :  { %408 = vmatpush3.bf16.msra.mxu1 %v446_v11  ;;  %v75_v27 = vld [vmem:[%s664_s2] sm:$0x3] }
  0x43   :  { %409 = vmatprep.subr.bf16.mxu1 %v447_v12  ;;  %v80_v29 = vrot.slane %v75_v27, %v79_v26  ;;  %v84_v30 = vrot.slane %v75_v27, %v83_v28  ;;  %v387_v44 = vld [vmem:[%s666_s4] ss:$0 sm:$0xff]  ;;  %s561_s4 = smov [#allocation9]  }
  0x44   :  { %386 = vmatmul.mubr.msk.bf16.vlgmr.msra.gmra.mrb[0].mxu0 %vm107_vm0, %v70_v10  ;;  %v404_v51 = vld [vmem:[%s667_s5] ss:$0 sm:$0xff]  ;;  %s372_s20 = sshll.u32 %s561_s4, 4  ;;  %s373_s20 = int_to_ptr.vmem [resolvable:$true] %s372_s20 }
  0x45   :  { %v345_v54 = vld [vmem:[#allocation2] sm:$0x1]  ;;  %s525_s21 = scalar_lea.vmem %s373_s20, 16  ;;  %s529_s5 = scalar_lea.vmem %s373_s20, 32 }
  0x46   :  { %410 = vmatpush3.bf16.msra.mxu1 %v448_v13  ;;  %p526_p10 = scmp.ne.s32.totalorder %s373_s20, %s525_s21  ;;  %p530_p11 = scmp.lt.s32.totalorder %s373_s20, %s373_s20 }
  0x47   :  { %411 = vmatprep.subr.bf16.mxu1 %v449_v14  ;;  %p531_p12 = scmp.lt.s32.totalorder %s529_s5, %s525_s21 }
  0x49   :  { %p532_p13 = por %p531_p12, %p530_p11 }
  0x4a   :  { %412 = vmatpush3.bf16.msra.mxu1 %v450_v15 }
  0x4b   :  { %413 = vmatprep.subr.bf16.mxu1 %v451_v16  ;;  %p533_p0 = pnand %p532_p13, %p526_p10 }
  0x4e   :  { %414 = vmatpush3.bf16.msra.mxu1 %v452_v17 }
  0x4f   :  { %415 = vmatprep.subr.bf16.mxu1 %v453_v18 }
  0x52   :  { %416 = vmatpush3.bf16.msra.mxu1 %v454_v19 }
  0x53   :  { %417 = vmatprep.subr.bf16.mxu1 %v455_v20 }
  0x56   :  { %418 = vmatpush3.bf16.msra.mxu1 %v456_v21 }
  0x57   :  { %419 = vmatprep.subr.bf16.mxu1 %v457_v22 }
  0x5a   :  { %420 = vmatpush3.bf16.msra.mxu1 %v458_v23 }
 0x117   :  { %v145_v31 = vpop.f32.mrb[0].mxu0 }
 0x118   :  { %v146_v32 = vadd.f32 %v145_v31, %v80_v29  ;;  %v147_v33 = vpop.f32.mrb[1].mxu0 }
 0x119   :  { %v148_v34 = vadd.f32 %v147_v33, %v84_v30  ;;  %v149_v35 = vpop.f32.mrb[2].mxu0 }
 0x11a   :  { %v152_v36 = vmul.f32 0.01, %v146_v32  ;;  %v150_v37 = vpop.f32.mrb[3].mxu0 }
 0x11b   :  { %v153_v38 = vmul.f32 0.01, %v148_v34 }
 0x11c   :  { %v154_v39 = vmax.f32 %v146_v32, %v152_v36 }
 0x11d   :  { %v155_v40 = vmax.f32 %v148_v34, %v153_v38 }
 0x11e   :  { %v156_v42 = vpack.c.bf16 %v154_v39, %v154_v39 }
 0x11f   :  { %v157_v41 = vpack.c.bf16 %v155_v40, %v155_v40 }
 0x121   :  { %325 = vmatprep.mubr.bf16.mxu1 %v157_v41 }
 0x122   :  { %326 = vmatmul.mubr.bf16.vlgmr.msra.gmra.mrb[0].mxu1 %v156_v42 }
 0x1f5   :  { %v421_v43 = vpop.f32.mrb[0].mxu1 }
 0x1f6   :  { %v422_v45 = vpop.f32.mrb[1].mxu1 }
 0x1f7   :  { %v423_v46 = vadd.f32 %v422_v45, %v421_v43  ;;  %v424_v47 = vpop.f32.mrb[2].mxu1 }
 0x1f8   :  { %v425_v48 = vpop.f32.mrb[3].mxu1 }
 0x1f9   :  { %v328_v49 = vadd.f32 %v423_v46, %v387_v44 }
 0x1fb   :  { %v333_v50 = vmul.f32 0.01, %v328_v49 }
 0x1fd   :  { %v334_v52 = vmax.f32 %v328_v49, %v333_v50 }
 0x1ff   :  { %v342_v53 = vmul.f32 %v404_v51, %v334_v52 }
 0x201   :  { %343 = vadd.xlane.f32.xlu0 %v342_v53 }
 0x217   :  { %348 = vperm.xlu0 %436, %v345_v54  }
 0x28e   :  { %v344_v55 = vpop.xlane.xlu0 %343 }
 0x296   :  { %v349_v57 = vpop.permute.xlu0 %348 }
 0x297   :  { %v354_v59 = vrot.slane %v349_v57, %v79_v26 }
 0x299   :  { %v355_v60 = vadd.f32 %v354_v59, %v344_v55 }
 0x29b   :  { %v362_v61 = vrot.slane %v355_v60, %v361_v58 }
 0x29d   :  { %365 = vst.msk [vmem:[#allocation9] sm:$0x1] %vm364_vm1, %v362_v61 }
 0x29e   :  { %536 = shalt.err (!%p533_p0)
}
 0x29f   :  { %s537_s24 = scalar_lea.hbm %s669_s7, 16 }
 0x2a0   :  { %p538_p1 = scmp.ne.s32.totalorder %s669_s7, %s537_s24  ;;  %p541_p2 = scmp.lt.u32.totalorder %s537_s24, %s669_s7 }
 0x2a2   :  { %p543_p3 = pnand %p541_p2, %p538_p1 }
 0x2a4   :  { %546 = shalt.err (!%p543_p3)
}
 0x2a5   :  { %375 = dma.vmem_to_hbm [thread:$0]  %s373_s20, 16, %s669_s7, [#allocation5]  }
 0x2a6   :  { %551 = dma.done.wait [#allocation5], 16  }
 0x2a7   :  { %552 = vsyncadd [#allocation5], 4294967280 }
 0x2a8   :  { %379 = vsyncpa [#allocation4], 1 }
 0x2a9   :  { %380 = vsyncpa [#allocation7], 1 }
 0x2aa   :  { %381 = vsyncpa [#allocation5], 1 }

</bundles_post_ra>
